<compile_context>
chip_gen: v7x
topology: tpu7x:2x2x1
jax: 0.10.0
libtpu: 0.0.40
codegen_flags: <defaults>
</compile_context>

<pallas_src>
import numpy as np
import jax
import jax.numpy as jnp
from jax.experimental import pallas as pl
from jax.experimental.pallas import tpu as pltpu


# ----------------------------- Pallas kernel -----------------------------
def _mlp_kernel(x_ref, w1_ref, b1_ref, w2_ref, b2_ref, o_ref):
    # First layer: x @ W1 + b1, tanh  (f32 MXU accumulation, f32 VPU/EUP math)
    h = jnp.dot(x_ref[...], w1_ref[...], preferred_element_type=jnp.float32)
    h = jnp.tanh(h + b1_ref[...])          # b1 is (1, Hp), broadcasts over rows
    # Second layer: h @ W2 + b2, tanh
    y = jnp.dot(h.astype(w2_ref.dtype), w2_ref[...],
                preferred_element_type=jnp.float32)
    o_ref[...] = jnp.tanh(y + b2_ref[...]).astype(o_ref.dtype)


def _round_up(x, m):
    return ((x + m - 1) // m) * m


def base_forward(obs, w1, b1, w2, b2, *, tile_b_max=512):
    """Two-layer tanh MLP as a single batch-tiled, lane-dense Pallas kernel.

    obs: (B, num_input) float32
    w1:  (num_input, H), b1: (1, H)
    w2:  (H, H),         b2: (1, H)
    returns (B, H) float32
    """
    B, num_input = obs.shape
    H = w1.shape[1]
    LANE = 128

    # Lane-dense padded sizes (zero padding is exact for this MLP).
    in_p = _round_up(num_input, LANE)
    h_p = _round_up(H, LANE)

    # Batch tiling: rows padded to a multiple of 8, tile capped at tile_b_max.
    b8 = _round_up(B, 8)
    tile_b = min(tile_b_max, b8)
    b_pad = _round_up(b8, tile_b)

    dt = obs.dtype
    obs_p = jnp.zeros((b_pad, in_p), dt).at[:B, :num_input].set(obs)
    w1_p = jnp.zeros((in_p, h_p), dt).at[:num_input, :H].set(w1)
    b1_p = jnp.zeros((1, h_p), dt).at[:, :H].set(b1)
    w2_p = jnp.zeros((h_p, h_p), dt).at[:H, :H].set(w2)
    b2_p = jnp.zeros((1, h_p), dt).at[:, :H].set(b2)

    grid = (b_pad // tile_b,)
    out_p = pl.pallas_call(
        _mlp_kernel,
        out_shape=jax.ShapeDtypeStruct((b_pad, h_p), dt),
        grid_spec=pl.GridSpec(
            grid=grid,
            in_specs=[
                # obs tile marches down the batch; weights/biases stay resident.
                pl.BlockSpec((tile_b, in_p), lambda i: (i, 0)),
                pl.BlockSpec((in_p, h_p), lambda i: (0, 0)),
                pl.BlockSpec((1, h_p), lambda i: (0, 0)),
                pl.BlockSpec((h_p, h_p), lambda i: (0, 0)),
                pl.BlockSpec((1, h_p), lambda i: (0, 0)),
            ],
            out_specs=pl.BlockSpec((tile_b, h_p), lambda i: (i, 0)),
        ),
        compiler_params=pltpu.CompilerParams(
            dimension_semantics=("parallel",)),
    )(obs_p, w1_p, b1_p, w2_p, b2_p)

    # Slice back to the logical (un-padded) shape.
    return out_p[:B, :H]


# --------------------- deterministic parameter init ----------------------
def orthogonal_init(key, rows, cols, gain):
    """Mimics torch.nn.init.orthogonal_ for a (rows, cols) matrix."""
    flat = jax.random.normal(key, (max(rows, cols), min(rows, cols)),
                             dtype=jnp.float32)
    q, r = jnp.linalg.qr(flat)
    d = jnp.diag(r)
    # sign correction (torch uses sign-of-diag; guard the zero case)
    q = q * jnp.where(d >= 0, 1.0, -1.0)[None, :]
    if rows < cols:
        q = q.T
    return gain * q[:rows, :cols]


def make_params(key, num_input, num_hidden):
    gain = float(np.sqrt(2))
    k1, k2 = jax.random.split(key)
    # PyTorch Linear weight is (out, in); transpose to (in, out) for x @ W.
    w1_t = orthogonal_init(k1, num_hidden, num_input, gain)   # (out, in)
    w2_t = orthogonal_init(k2, num_hidden, num_hidden, gain)  # (out, in)
    w1 = jnp.asarray(w1_t.T, jnp.float32)                     # (in, out)
    w2 = jnp.asarray(w2_t.T, jnp.float32)                     # (in, out)
    b1 = jnp.zeros((1, num_hidden), jnp.float32)
    b2 = jnp.zeros((1, num_hidden), jnp.float32)
    return w1, b1, w2, b2


# ------------------------------ reference --------------------------------
def base_forward_ref(obs, w1, b1, w2, b2):
    h = jnp.tanh(obs @ w1 + b1)
    return jnp.tanh(h @ w2 + b2)


if __name__ == "__main__":
    num_input, num_hidden, batch = 32, 32, 20   # batch not a multiple of 8
    key = jax.random.PRNGKey(0)                 # exercises padding/slicing
    k_obs, k_param = jax.random.split(key)

    obs = jax.random.normal(k_obs, (batch, num_input), dtype=jnp.float32)
    w1, b1, w2, b2 = make_params(k_param, num_input, num_hidden)

    out = base_forward(obs, w1, b1, w2, b2)
    out = jax.block_until_ready(out)

    ref = base_forward_ref(obs, w1, b1, w2, b2)
    np.testing.assert_allclose(np.asarray(out), np.asarray(ref),
                               rtol=1e-5, atol=1e-5)
    print("KERNEL_OK")
</pallas_src>

<mosaic_0001>
module attributes {stable_mosaic.version = 11 : i64} {
  func.func @_mlp_kernel(%arg0: i32, %arg1: memref<24x128xf32, #tpu.memory_space<vmem>>, %arg2: memref<128x128xf32, #tpu.memory_space<vmem>>, %arg3: memref<1x128xf32, #tpu.memory_space<vmem>>, %arg4: memref<128x128xf32, #tpu.memory_space<vmem>>, %arg5: memref<1x128xf32, #tpu.memory_space<vmem>>, %arg6: memref<24x128xf32, #tpu.memory_space<vmem>>) attributes {dimension_semantics = [#tpu.dimension_semantics<parallel>], iteration_bounds = array<i64: 1>, scalar_prefetch = 0 : i64, scratch_operands = 0 : i64, tpu.core_type = #tpu.core_type<tc>, window_params = [{transform_indices = @transform_0, window_bounds = array<i64: 24, 128>}, {pipeline_mode = #tpu.pipeline_mode<synchronous>, transform_indices = @transform_1, window_bounds = array<i64: 128, 128>}, {pipeline_mode = #tpu.pipeline_mode<synchronous>, transform_indices = @transform_2, window_bounds = array<i64: 1, 128>}, {pipeline_mode = #tpu.pipeline_mode<synchronous>, transform_indices = @transform_3, window_bounds = array<i64: 128, 128>}, {pipeline_mode = #tpu.pipeline_mode<synchronous>, transform_indices = @transform_4, window_bounds = array<i64: 1, 128>}, {transform_indices = @transform_5, window_bounds = array<i64: 24, 128>}]} {
    %c0 = arith.constant 0 : index
    %c0_0 = arith.constant 0 : index
    %0 = vector.load %arg1[%c0, %c0_0] : memref<24x128xf32, #tpu.memory_space<vmem>>, vector<24x128xf32>
    %c0_1 = arith.constant 0 : index
    %c0_2 = arith.constant 0 : index
    %1 = vector.load %arg2[%c0_1, %c0_2] : memref<128x128xf32, #tpu.memory_space<vmem>>, vector<128x128xf32>
    %cst = arith.constant dense<0.000000e+00> : vector<24x128xf32>
    %2 = tpu.matmul %0, %1, %cst {dimension_numbers = #tpu.dot_dimension_numbers<[1], [0], [0], [1], [0, 0, 1, 1], [], []>} : vector<24x128xf32>, vector<128x128xf32>, vector<24x128xf32> -> vector<24x128xf32>
    %c0_3 = arith.constant 0 : index
    %c0_4 = arith.constant 0 : index
    %3 = vector.load %arg3[%c0_3, %c0_4] : memref<1x128xf32, #tpu.memory_space<vmem>>, vector<1x128xf32>
    %4 = vector.broadcast %3 : vector<1x128xf32> to vector<24x128xf32>
    %5 = arith.addf %2, %4 : vector<24x128xf32>
    %6 = math.tanh %5 : vector<24x128xf32>
    %c0_5 = arith.constant 0 : index
    %c0_6 = arith.constant 0 : index
    %7 = vector.load %arg4[%c0_5, %c0_6] : memref<128x128xf32, #tpu.memory_space<vmem>>, vector<128x128xf32>
    %cst_7 = arith.constant dense<0.000000e+00> : vector<24x128xf32>
    %8 = tpu.matmul %6, %7, %cst_7 {dimension_numbers = #tpu.dot_dimension_numbers<[1], [0], [0], [1], [0, 0, 1, 1], [], []>} : vector<24x128xf32>, vector<128x128xf32>, vector<24x128xf32> -> vector<24x128xf32>
    %c0_8 = arith.constant 0 : index
    %c0_9 = arith.constant 0 : index
    %9 = vector.load %arg5[%c0_8, %c0_9] : memref<1x128xf32, #tpu.memory_space<vmem>>, vector<1x128xf32>
    %10 = vector.broadcast %9 : vector<1x128xf32> to vector<24x128xf32>
    %11 = arith.addf %8, %10 : vector<24x128xf32>
    %12 = math.tanh %11 : vector<24x128xf32>
    %c0_10 = arith.constant 0 : index
    %c0_11 = arith.constant 0 : index
    %13 = vector.load %arg6[%c0_10, %c0_11] : memref<24x128xf32, #tpu.memory_space<vmem>>, vector<24x128xf32>
    tpu.vector_store %arg6[%c0_10, %c0_11], %12 {strides = array<i32>} : memref<24x128xf32, #tpu.memory_space<vmem>>, vector<24x128xf32>,
    return
  }
  func.func @transform_0(%arg0: i32) -> (i32, i32) {
    %c0_i32 = arith.constant 0 : i32
    %c0_i32_0 = arith.constant 0 : i32
    return %arg0, %c0_i32 : i32, i32
  }
  func.func @transform_1(%arg0: i32) -> (i32, i32) {
    %c0_i32 = arith.constant 0 : i32
    %c0_i32_0 = arith.constant 0 : i32
    %c0_i32_1 = arith.constant 0 : i32
    return %c0_i32, %c0_i32_0 : i32, i32
  }
  func.func @transform_2(%arg0: i32) -> (i32, i32) {
    %c0_i32 = arith.constant 0 : i32
    %c0_i32_0 = arith.constant 0 : i32
    %c0_i32_1 = arith.constant 0 : i32
    return %c0_i32, %c0_i32_0 : i32, i32
  }
  func.func @transform_3(%arg0: i32) -> (i32, i32) {
    %c0_i32 = arith.constant 0 : i32
    %c0_i32_0 = arith.constant 0 : i32
    %c0_i32_1 = arith.constant 0 : i32
    return %c0_i32, %c0_i32_0 : i32, i32
  }
  func.func @transform_4(%arg0: i32) -> (i32, i32) {
    %c0_i32 = arith.constant 0 : i32
    %c0_i32_0 = arith.constant 0 : i32
    %c0_i32_1 = arith.constant 0 : i32
    return %c0_i32, %c0_i32_0 : i32, i32
  }
  func.func @transform_5(%arg0: i32) -> (i32, i32) {
    %c0_i32 = arith.constant 0 : i32
    %c0_i32_0 = arith.constant 0 : i32
    return %arg0, %c0_i32 : i32, i32
  }
}

</mosaic_0001>

<bundles_post_ra>
// kernel: tpu_custom_call.1
= control target key start
LH: loop header
LB: loop body
LE: loop exit
PB: predicated region body
PF: predicated region fallthrough
CT: control target
= control target key end

     0   :  { %10 = vsyncpa [#allocation3], 0  ;;  %s723_s0 = inlined_call_operand.hbm [shape: f32[24,128], index: 0, kind: input, shape index: {}]   ;;  %s724_s1 = inlined_call_operand.hbm [shape: f32[128,128], index: 1, kind: input, shape index: {}]   ;;  %s725_s2 = inlined_call_operand.vmem [shape: f32[1,128], index: 2, kind: input, shape index: {}]   ;;  %s726_s3 = inlined_call_operand.hbm [shape: f32[128,128], index: 3, kind: input, shape index: {}]   ;;  %s727_s4 = inlined_call_operand.vmem [shape: f32[1,128], index: 4, kind: input, shape index: {}]   ;;  %s728_s5 = inlined_call_operand.hbm [shape: f32[24,128], index: 5, kind: output, shape index: {}]  }
   0x1   :  { %11 = vsyncpa [#allocation6], 0 }
   0x2   :  { %12 = vsyncpa [#allocation4], 0  ;;  %s583_s18 = smov [#allocation5]   ;;  %s584_s20 = smov [#allocation2]  }
   0x3   :  { %s30_s19 = sshll.u32 %s583_s18, 4  ;;  %s18_s21 = sshll.u32 %s584_s20, 4  ;;  %s31_s19 = int_to_ptr.vmem [resolvable:$true] %s30_s19  ;;  %s622_s21 = int_to_ptr.vmem [resolvable:$true] %s18_s21 }
   0x4   :  { %s489_s24 = scalar_lea.hbm %s724_s1, 2048 }
   0x5   :  { %p490_p0 = scmp.ne.s32.totalorder %s724_s1, %s489_s24  ;;  %p493_p1 = scmp.lt.u32.totalorder %s489_s24, %s724_s1 }
   0x7   :  { %p495_p2 = pnand %p493_p1, %p490_p0 }
   0x9   :  { %498 = shalt.err (!%p495_p2)
}
   0xa   :  { %s499_s29 = scalar_lea.vmem %s31_s19, 2048  ;;  %p504_p4 = scmp.lt.s32.totalorder %s31_s19, %s31_s19 }
   0xb   :  { %p500_p3 = scmp.ne.s32.totalorder %s31_s19, %s499_s29  ;;  %p505_p5 = scmp.lt.s32.totalorder %s499_s29, %s499_s29 }
   0xd   :  { %p506_p6 = por %p505_p5, %p504_p4 }
   0xf   :  { %p507_p7 = pnand %p506_p6, %p500_p3 }
  0x11   :  { %510 = shalt.err (!%p507_p7)
}
  0x12   :  { %s585_s30 = smov 128   ;;  %s586_s6 = smov 8  }
  0x13   :  { %36 = dma.hbm_to_vmem [thread:$0]  %s724_s1, 2048, %s31_s19, [#allocation6], %s585_s30, %s585_s30, %s586_s6  }
  0x14   :  { %s511_s11 = scalar_lea.hbm %s723_s0, 384 }
  0x15   :  { %p512_p8 = scmp.ne.s32.totalorder %s723_s0, %s511_s11  ;;  %p515_p9 = scmp.lt.u32.totalorder %s511_s11, %s723_s0 }
  0x17   :  { %p517_p10 = pnand %p515_p9, %p512_p8 }
  0x19   :  { %520 = shalt.err (!%p517_p10)
}
  0x1a   :  { %s521_s16 = scalar_lea.vmem %s622_s21, 384  ;;  %p526_p12 = scmp.lt.s32.totalorder %s622_s21, %s622_s21 }
  0x1b   :  { %p522_p11 = scmp.ne.s32.totalorder %s622_s21, %s521_s16  ;;  %p527_p13 = scmp.lt.s32.totalorder %s521_s16, %s521_s16 }
  0x1d   :  { %p528_p0 = por %p527_p13, %p526_p12 }
  0x1f   :  { %p529_p1 = pnand %p528_p0, %p522_p11 }
  0x21   :  { %532 = shalt.err (!%p529_p1)
}
  0x22   :  { %24 = dma.hbm_to_vmem [thread:$0]  %s723_s0, 384, %s622_s21, [#allocation3], %s585_s30, %s585_s30, %s586_s6  }
  0x23   :  { %s587_s18 = smov [#allocation7]   ;;  %s533_s23 = scalar_lea.hbm %s726_s3, 2048 }
  0x24   :  { %s44_s19 = sshll.u32 %s587_s18, 4  ;;  %p534_p2 = scmp.ne.s32.totalorder %s726_s3, %s533_s23  ;;  %s45_s19 = int_to_ptr.vmem [resolvable:$true] %s44_s19 }
  0x25   :  { %p537_p3 = scmp.lt.u32.totalorder %s533_s23, %s726_s3 }
  0x27   :  { %p539_p4 = pnand %p537_p3, %p534_p2 }
  0x29   :  { %542 = shalt.err (!%p539_p4)
}
  0x2a   :  { %s543_s28 = scalar_lea.vmem %s45_s19, 2048  ;;  %p548_p6 = scmp.lt.s32.totalorder %s45_s19, %s45_s19 }
  0x2b   :  { %p544_p5 = scmp.ne.s32.totalorder %s45_s19, %s543_s28  ;;  %p549_p7 = scmp.lt.s32.totalorder %s543_s28, %s543_s28 }
  0x2d   :  { %p550_p8 = por %p549_p7, %p548_p6 }
  0x2f   :  { %p551_p9 = pnand %p550_p8, %p544_p5 }
  0x31   :  { %554 = shalt.err (!%p551_p9)
}
  0x32   :  { %50 = dma.hbm_to_vmem [thread:$0]  %s726_s3, 2048, %s45_s19, [#allocation6], %s585_s30, %s585_s30, %s586_s6  }
  0x33   :  { %577 = dma.done.wait [#allocation3], 384  }
  0x34   :  { %578 = vsyncadd [#allocation3], 4294966912 }
  0x35   :  { %579 = dma.done.wait [#allocation6], 4096  }
  0x36   :  { %580 = vsyncadd [#allocation6], 4294963200  ;;  %v588_v0 = vmov 0.0|0.0   ;;  %vm589_vm0 = vmmov 0   ;;  %v590_v1 = vmov 0.0   ;;  %v65_v2 = vld [vmem:[#allocation5] sm:$0xff] }
  0x37   :  { %420 = vmatprep.subr.bf16.mxu0 %v588_v0  ;;  %370 = vmatprep.mubr.msk.f32.mxu0 %vm589_vm0, %v590_v1  ;;  %v66_v3 = vld [vmem:[#allocation5 + $0x8] sm:$0xff]  ;;  %v67_v4 = vld [vmem:[#allocation5 + $0x10] sm:$0xff]  ;;  %v68_v6 = vld [vmem:[#allocation5 + $0x18] sm:$0xff]  ;;  %s591_s8 = smov [#allocation8]  }
  0x38   :  { %444 = vmatprep.subr.bf16.mxu1 %v588_v0  ;;  %411 = vmatprep.mubr.msk.f32.mxu1 %vm589_vm0, %v590_v1  ;;  %v421_v5 = vpack.c.bf16 %v66_v3, %v65_v2  ;;  %v424_v7 = vpack.c.bf16 %v68_v6, %v67_v4  ;;  %v69_v8 = vld [vmem:[#allocation5 + $0x20] sm:$0xff]  ;;  %v70_v9 = vld [vmem:[#allocation5 + $0x28] sm:$0xff]  ;;  %v173_v14 = vld [vmem:[#allocation7 + $0x10] sm:$0xff]  ;;  %s285_s9 = sshll.u32 %s591_s8, 4  ;;  %s286_s9 = int_to_ptr.vmem [resolvable:$true] %s285_s9 }
  0x39   :  { %v171_v10 = vld [vmem:[#allocation7] sm:$0xff]  ;;  %v172_v11 = vld [vmem:[#allocation7 + $0x8] sm:$0xff]  ;;  %v427_v12 = vpack.c.bf16 %v70_v9, %v69_v8  ;;  %v174_v15 = vld [vmem:[#allocation7 + $0x18] sm:$0xff]  ;;  %p560_p11 = scmp.lt.s32.totalorder %s286_s9, %s286_s9 }
  0x3a   :  { %422 = vmatpush3.bf16.msra.mxu0 %v421_v5  ;;  %v445_v13 = vpack.c.bf16 %v172_v11, %v171_v10  ;;  %v71_v16 = vld [vmem:[#allocation5 + $0x30] sm:$0xff]  ;;  %v72_v17 = vld [vmem:[#allocation5 + $0x38] sm:$0xff]  ;;  %v448_v18 = vpack.c.bf16 %v174_v15, %v173_v14  ;;  %v175_v19 = vld [vmem:[#allocation7 + $0x20] sm:$0xff] }
  0x3b   :  { %423 = vmatprep.subr.bf16.mxu0 %v588_v0  ;;  %v176_v20 = vld [vmem:[#allocation7 + $0x28] sm:$0xff]  ;;  %v430_v21 = vpack.c.bf16 %v72_v17, %v71_v16  ;;  %v73_v22 = vld [vmem:[#allocation5 + $0x40] sm:$0xff]  ;;  %v177_v25 = vld [vmem:[#allocation7 + $0x30] sm:$0xff] }
  0x3c   :  { %446 = vmatpush3.bf16.msra.mxu1 %v445_v13  ;;  %v74_v23 = vld [vmem:[#allocation5 + $0x48] sm:$0xff]  ;;  %v451_v24 = vpack.c.bf16 %v176_v20, %v175_v19  ;;  %v178_v26 = vld [vmem:[#allocation7 + $0x38] sm:$0xff]  ;;  %v75_v28 = vld [vmem:[#allocation5 + $0x50] sm:$0xff] }
  0x3d   :  { %447 = vmatprep.subr.bf16.mxu1 %v588_v0  ;;  %v433_v27 = vpack.c.bf16 %v74_v23, %v73_v22  ;;  %v76_v29 = vld [vmem:[#allocation5 + $0x58] sm:$0xff]  ;;  %v454_v30 = vpack.c.bf16 %v178_v26, %v177_v25  ;;  %v179_v31 = vld [vmem:[#allocation7 + $0x40] sm:$0xff]  ;;  %v180_v32 = vld [vmem:[#allocation7 + $0x48] sm:$0xff] }
  0x3e   :  { %425 = vmatpush3.bf16.msra.mxu0 %v424_v7  ;;  %v436_v33 = vpack.c.bf16 %v76_v29, %v75_v28  ;;  %v77_v34 = vld [vmem:[#allocation5 + $0x60] sm:$0xff]  ;;  %v78_v35 = vld [vmem:[#allocation5 + $0x68] sm:$0xff]  ;;  %v457_v36 = vpack.c.bf16 %v180_v32, %v179_v31  ;;  %v79_v38 = vld [vmem:[#allocation5 + $0x70] sm:$0xff] }
  0x3f   :  { %426 = vmatprep.subr.bf16.mxu0 %v588_v0  ;;  %v439_v37 = vpack.c.bf16 %v78_v35, %v77_v34  ;;  %v80_v39 = vld [vmem:[#allocation5 + $0x78] sm:$0xff]  ;;  %v62_v41 = vld [vmem:[#allocation2] sm:$0xff]  ;;  %v63_v42 = vld [vmem:[#allocation2 + $0x8] sm:$0xff] }
  0x40   :  { %449 = vmatpush3.bf16.msra.mxu1 %v448_v18  ;;  %v442_v40 = vpack.c.bf16 %v80_v39, %v79_v38  ;;  %v64_v43 = vld [vmem:[#allocation2 + $0x10] sm:$0xff]  ;;  %v181_v44 = vld [vmem:[#allocation7 + $0x50] sm:$0xff]  ;;  %v183_v47 = vld [vmem:[#allocation7 + $0x60] sm:$0xff] }
  0x41   :  { %450 = vmatprep.subr.bf16.mxu1 %v588_v0  ;;  %v182_v45 = vld [vmem:[#allocation7 + $0x58] sm:$0xff]  ;;  %v184_v48 = vld [vmem:[#allocation7 + $0x68] sm:$0xff]  ;;  %v185_v50 = vld [vmem:[#allocation7 + $0x70] sm:$0xff] }
  0x42   :  { %428 = vmatpush3.bf16.msra.mxu0 %v427_v12  ;;  %v460_v46 = vpack.c.bf16 %v182_v45, %v181_v44  ;;  %v463_v49 = vpack.c.bf16 %v184_v48, %v183_v47  ;;  %v186_v51 = vld [vmem:[#allocation7 + $0x78] sm:$0xff]  ;;  %v298_v53 = vld [vmem:[%s725_s2] ss:$0 sm:$0xff] }
  0x43   :  { %429 = vmatprep.subr.bf16.mxu0 %v588_v0  ;;  %v466_v52 = vpack.c.bf16 %v186_v51, %v185_v50  ;;  %v299_v3 = vld [vmem:[%s727_s4] ss:$0 sm:$0xff]  ;;  %s555_s4 = scalar_lea.vmem %s286_s9, 384 }
  0x44   :  { %452 = vmatpush3.bf16.msra.mxu1 %v451_v24  ;;  %p556_p10 = scmp.ne.s32.totalorder %s286_s9, %s555_s4  ;;  %p561_p12 = scmp.lt.s32.totalorder %s555_s4, %s555_s4 }
  0x45   :  { %453 = vmatprep.subr.bf16.mxu1 %v588_v0 }
  0x46   :  { %431 = vmatpush3.bf16.msra.mxu0 %v430_v21  ;;  %p562_p13 = por %p561_p12, %p560_p11 }
  0x47   :  { %432 = vmatprep.subr.bf16.mxu0 %v588_v0 }
  0x48   :  { %455 = vmatpush3.bf16.msra.mxu1 %v454_v30  ;;  %p563_p0 = pnand %p562_p13, %p556_p10 }
  0x49   :  { %456 = vmatprep.subr.bf16.mxu1 %v588_v0 }
  0x4a   :  { %434 = vmatpush3.bf16.msra.mxu0 %v433_v27 }
  0x4b   :  { %435 = vmatprep.subr.bf16.mxu0 %v588_v0 }
  0x4c   :  { %458 = vmatpush3.bf16.msra.mxu1 %v457_v36 }
  0x4d   :  { %459 = vmatprep.subr.bf16.mxu1 %v588_v0 }
  0x4e   :  { %437 = vmatpush3.bf16.msra.mxu0 %v436_v33 }
  0x4f   :  { %438 = vmatprep.subr.bf16.mxu0 %v588_v0 }
  0x50   :  { %461 = vmatpush3.bf16.msra.mxu1 %v460_v46 }
  0x51   :  { %462 = vmatprep.subr.bf16.mxu1 %v588_v0 }
  0x52   :  { %440 = vmatpush3.bf16.msra.mxu0 %v439_v37 }
  0x53   :  { %441 = vmatprep.subr.bf16.mxu0 %v588_v0 }
  0x54   :  { %464 = vmatpush3.bf16.msra.mxu1 %v463_v49 }
  0x55   :  { %465 = vmatprep.subr.bf16.mxu1 %v588_v0 }
  0x56   :  { %443 = vmatpush3.bf16.msra.mxu0 %v442_v40 }
  0x58   :  { %467 = vmatpush3.bf16.msra.mxu1 %v466_v52 }
  0x59   :  { %371 = vmatmul.mubr.f32.vlgmr.msra.gmra.mrb[0].mxu0 %v62_v41 }
  0x5a   :  { %373 = vmatprep.mubr.msk.f32.mxu0 %vm589_vm0, %v590_v1 }
  0x5d   :  { %374 = vmatmul.mubr.f32.gmra.mrb[2].mxu0 %v63_v42 }
  0x5e   :  { %376 = vmatprep.mubr.msk.f32.mxu0 %vm589_vm0, %v590_v1 }
  0x61   :  { %377 = vmatmul.mubr.f32.gmra.mrb[4].mxu0 %v64_v43 }
 0x12c   :  { %v154_v54 = vpop.f32.mrb[0].mxu0 }
 0x12d   :  { %v155_v55 = vadd.f32 %v298_v53, %v154_v54  ;;  %v372_v56 = vpop.f32.mrb[1].mxu0 }
 0x12f   :  { %477 = vtanh.f32 %v155_v55 }
 0x130   :  { %v159_v57 = vpop.f32.mrb[2].mxu0 }
 0x131   :  { %v160_v58 = vadd.f32 %v298_v53, %v159_v57  ;;  %v375_v59 = vpop.f32.mrb[3].mxu0 }
 0x133   :  { %479 = vtanh.f32 %v160_v58 }
 0x134   :  { %v164_v60 = vpop.f32.mrb[4].mxu0 }
 0x135   :  { %v165_v61 = vadd.f32 %v298_v53, %v164_v60  ;;  %v378_v62 = vpop.f32.mrb[5].mxu0 }
 0x137   :  { %481 = vtanh.f32 %v165_v61 }
 0x139   :  { %v478_v63 = vpop.eup %477 }
 0x13a   :  { %412 = vmatmul.mubr.f32.vlgmr.msra.gmra.mrb[0].mxu1 %v478_v63 }
 0x13b   :  { %414 = vmatprep.mubr.msk.f32.mxu1 %vm589_vm0, %v590_v1 }
 0x13d   :  { %v480_v0 = vpop.eup %479 }
 0x13e   :  { %415 = vmatmul.mubr.f32.gmra.mrb[2].mxu1 %v480_v0 }
 0x13f   :  { %417 = vmatprep.mubr.msk.f32.mxu1 %vm589_vm0, %v590_v1 }
 0x141   :  { %v482_v2 = vpop.eup %481 }
 0x142   :  { %418 = vmatmul.mubr.f32.gmra.mrb[4].mxu1 %v482_v2 }
 0x20d   :  { %v260_v4 = vpop.f32.mrb[0].mxu1 }
 0x20e   :  { %v261_v5 = vadd.f32 %v299_v3, %v260_v4  ;;  %v413_v6 = vpop.f32.mrb[1].mxu1 }
 0x210   :  { %483 = vtanh.f32 %v261_v5 }
 0x211   :  { %v265_v7 = vpop.f32.mrb[2].mxu1 }
 0x212   :  { %v266_v8 = vadd.f32 %v299_v3, %v265_v7  ;;  %v416_v9 = vpop.f32.mrb[3].mxu1 }
 0x214   :  { %485 = vtanh.f32 %v266_v8 }
 0x215   :  { %v270_v10 = vpop.f32.mrb[4].mxu1 }
 0x216   :  { %v271_v11 = vadd.f32 %v299_v3, %v270_v10  ;;  %v419_v12 = vpop.f32.mrb[5].mxu1 }
 0x218   :  { %487 = vtanh.f32 %v271_v11 }
 0x21a   :  { %v484_v13 = vpop.eup %483 }
 0x21b   :  { %277 = vst [vmem:[#allocation8] sm:$0xff] %v484_v13 }
 0x21e   :  { %v486_v1 = vpop.eup %485 }
 0x21f   :  { %278 = vst [vmem:[#allocation8 + $0x8] sm:$0xff] %v486_v1 }
 0x222   :  { %v488_v14 = vpop.eup %487 }
 0x223   :  { %279 = vst [vmem:[#allocation8 + $0x10] sm:$0xff] %v488_v14 }
 0x224   :  { %566 = shalt.err (!%p563_p0)
}
 0x225   :  { %s567_s12 = scalar_lea.hbm %s728_s5, 384 }
 0x226   :  { %p568_p1 = scmp.ne.s32.totalorder %s728_s5, %s567_s12  ;;  %p571_p2 = scmp.lt.u32.totalorder %s567_s12, %s728_s5 }
 0x228   :  { %p573_p3 = pnand %p571_p2, %p568_p1 }
 0x22a   :  { %576 = shalt.err (!%p573_p3)
}
 0x22b   :  { %291 = dma.vmem_to_hbm [thread:$0]  %s286_s9, 384, %s728_s5, [#allocation4], %s585_s30, %s585_s30, %s586_s6  }
 0x22c   :  { %581 = dma.done.wait [#allocation4], 384  }
 0x22d   :  { %582 = vsyncadd [#allocation4], 4294966912 }
 0x22e   :  { %295 = vsyncpa [#allocation3], 1 }
 0x22f   :  { %296 = vsyncpa [#allocation6], 1 }
 0x230   :  { %297 = vsyncpa [#allocation4], 1 }

</bundles_post_ra>
